<compile_context>
chip_gen: v7x
topology: tpu7x:2x2x1
jax: 0.10.0
libtpu: 0.0.40
codegen_flags: <defaults>
</compile_context>

<pallas_src>
import jax
import jax.numpy as jnp
from jax.experimental import pallas as pl
from jax.experimental.pallas import tpu as pltpu


def _classifier_kernel(h_ref, w_ref, b_ref, out_ref):
    """h_ref  : VMEM (TB, H)      hidden-state tile (native dtype)
       w_ref  : VMEM (H, C_pad)   pre-transposed, lane-padded Linear weight
       b_ref  : VMEM (1, C_pad)   f32 bias (-1e30 in the padded lanes)
       out_ref: VMEM (TB, C_pad)  log-probabilities"""
    # MXU matmul in the inputs' native dtype with f32 accumulation; the bias
    # add and all softmax math run in f32 on the VPU/EUP.
    logits = jnp.dot(h_ref[...], w_ref[...],
                     preferred_element_type=jnp.float32) + b_ref[...]

    # Numerically stable log-softmax along the class (lane) axis.
    m = jnp.max(logits, axis=-1, keepdims=True)
    shifted = logits - m
    sumexp = jnp.sum(jnp.exp(shifted), axis=-1, keepdims=True)
    out_ref[...] = (shifted - jnp.log(sumexp)).astype(out_ref.dtype)


def _round_up(x, m):
    return ((x + m - 1) // m) * m


# Conservative VMEM budget: leaves headroom even on v7x (64 MiB physical).
_VMEM_BUDGET = 48 * 1024 * 1024


def _build_call(B, H, C_pad, tb, out_dtype, *, single_buffer_consts, vmem_limit):
    if single_buffer_consts:
        # Constant index_map -> the weight/bias never change between grid
        # steps; a second pipeline buffer would be pure VMEM waste.
        w_spec = pl.BlockSpec((H, C_pad), lambda i: (0, 0),
                              pipeline_mode=pl.Buffered(1))
        b_spec = pl.BlockSpec((1, C_pad), lambda i: (0, 0),
                              pipeline_mode=pl.Buffered(1))
    else:
        w_spec = pl.BlockSpec((H, C_pad), lambda i: (0, 0))
        b_spec = pl.BlockSpec((1, C_pad), lambda i: (0, 0))

    return pl.pallas_call(
        _classifier_kernel,
        out_shape=jax.ShapeDtypeStruct((B, C_pad), out_dtype),
        grid_spec=pltpu.PrefetchScalarGridSpec(
            num_scalar_prefetch=0,
            grid=(pl.cdiv(B, tb),),
            in_specs=[
                pl.BlockSpec((tb, H), lambda i: (i, 0)),   # hidden-state tile
                w_spec,                                    # weight (resident)
                b_spec,                                    # bias   (resident)
            ],
            out_specs=pl.BlockSpec((tb, C_pad), lambda i: (i, 0)),
        ),
        compiler_params=pltpu.CompilerParams(
            dimension_semantics=("parallel",),
            vmem_limit_bytes=vmem_limit),
    )


def classifier_network(h_t: jax.Array, weight: jax.Array, bias: jax.Array,
                       *, block_b: int = 512) -> jax.Array:
    """h_t: (B, H); weight: (C, H) (PyTorch nn.Linear layout); bias: (C,).
    Returns (B, C) log-probabilities, matching ClassifierNetwork.forward."""
    B, H = h_t.shape
    C, H_w = weight.shape
    assert H == H_w, "hidden size mismatch"

    # Lane-dense class axis: pad C up to a multiple of 128 so softmax vregs
    # are full and the output store is an unmasked, lane-dense `vst`.
    C_pad = max(128, _round_up(C, 128))

    # One-time parameter layout prep (tiny; constant-folds under jit).
    # TODO(synk): for large heads, keep the weight stored pre-transposed (H, C)
    # in the model state instead of transposing on every call.
    w_t = weight.T.astype(h_t.dtype)             # (H, C): plain h @ w on MXU
    b_f32 = bias.astype(jnp.float32)
    if C_pad != C:
        w_t = jnp.pad(w_t, ((0, 0), (0, C_pad - C)))
        # Fake (padded) classes get a huge negative bias so exp() underflows
        # to zero and they cannot perturb the softmax denominator.
        b_f32 = jnp.pad(b_f32, (0, C_pad - C), constant_values=-1e30)
    b2 = b_f32.reshape(1, C_pad)

    # ---- batch tiling --------------------------------------------------
    tb = min(block_b, B)
    if tb < B:
        tb = max(8, (tb // 8) * 8)               # sublane-aligned tiles
    elif B >= 16:
        # Whole batch would fit in one block: still split into >=2 tiles so
        # the "parallel" grid axis shards across both TensorCores on v7x.
        tb = _round_up(pl.cdiv(B, 2), 8)

    in_b = jnp.dtype(h_t.dtype).itemsize
    w_b = jnp.dtype(w_t.dtype).itemsize
    out_b = jnp.dtype(h_t.dtype).itemsize

    def vmem_est(tb_):
        return (2 * tb_ * H * in_b               # double-buffered h tiles
                + 2 * tb_ * C_pad * out_b        # double-buffered out tiles
                + 2 * H * C_pad * w_b            # weight (worst case 2 bufs)
                + 2 * 8 * C_pad * 4)             # bias block (sublane-padded)

    while tb > 8 and vmem_est(tb) > _VMEM_BUDGET:
        tb = max(8, ((tb // 2) // 8) * 8)

    vmem_limit = int(min(64 * 1024 * 1024,
                         max(32 * 1024 * 1024, vmem_est(tb) + (8 << 20))))

    # TODO(synk): vocab-scale C (or huge H) needs a class-axis grid dimension
    # with an online log-softmax; this design keeps the whole (H, C_pad)
    # weight block resident in VMEM.
    call_args = (B, H, C_pad, tb, h_t.dtype)
    try:
        out_padded = _build_call(*call_args, single_buffer_consts=True,
                                 vmem_limit=vmem_limit)(h_t, w_t, b2)
    except Exception:
        # Older JAX without BlockSpec.pipeline_mode / Buffered(1) support:
        # fall back to default double-buffered constants.
        out_padded = _build_call(*call_args, single_buffer_consts=False,
                                 vmem_limit=vmem_limit)(h_t, w_t, b2)

    return out_padded[:, :C]


if __name__ == "__main__":
    key = jax.random.PRNGKey(0)
    k_h, k_w, k_b, k_h2 = jax.random.split(key, 4)

    H, C = 32, 28  # hidden_size, n_classes

    # PyTorch nn.Linear weight layout: (out_features, in_features)
    weight = jax.random.normal(k_w, (C, H), dtype=jnp.float32) * (1.0 / jnp.sqrt(H))
    bias = jax.random.normal(k_b, (C,), dtype=jnp.float32) * 0.1

    # Case 1: small batch, single tile, padded class axis (C=28 -> 128 lanes).
    h1 = jax.random.normal(k_h, (8, H), dtype=jnp.float32)
    out1 = jax.block_until_ready(classifier_network(h1, weight, bias))
    ref1 = jax.nn.log_softmax(h1 @ weight.T + bias, axis=-1)
    assert out1.shape == (8, C)
    assert jnp.allclose(out1, ref1, atol=1e-5, rtol=1e-5), "case 1 mismatch"

    # Case 2: ragged batch -> cdiv grid with 2 tiles (exercises padding of the
    # last block and the megacore-friendly >=2-step grid).
    h2 = jax.random.normal(k_h2, (20, H), dtype=jnp.float32)
    out2 = jax.block_until_ready(classifier_network(h2, weight, bias))
    ref2 = jax.nn.log_softmax(h2 @ weight.T + bias, axis=-1)
    assert out2.shape == (20, C)
    assert jnp.allclose(out2, ref2, atol=1e-5, rtol=1e-5), "case 2 mismatch"

    print("KERNEL_OK")
</pallas_src>

<mosaic_0001>
module attributes {stable_mosaic.version = 11 : i64} {
  func.func @_classifier_kernel(%arg0: i32, %arg1: memref<8x32xf32, #tpu.memory_space<vmem>>, %arg2: memref<32x128xf32, #tpu.memory_space<vmem>>, %arg3: memref<1x128xf32, #tpu.memory_space<vmem>>, %arg4: memref<8x128xf32, #tpu.memory_space<vmem>>) attributes {dimension_semantics = [#tpu.dimension_semantics<parallel>], iteration_bounds = array<i64: 1>, scalar_prefetch = 0 : i64, scratch_operands = 0 : i64, tpu.core_type = #tpu.core_type<tc>, window_params = [{transform_indices = @transform_0, window_bounds = array<i64: 8, 32>}, {pipeline_mode = #tpu.pipeline_mode<synchronous>, transform_indices = @transform_1, window_bounds = array<i64: 32, 128>}, {pipeline_mode = #tpu.pipeline_mode<synchronous>, transform_indices = @transform_2, window_bounds = array<i64: 1, 128>}, {transform_indices = @transform_3, window_bounds = array<i64: 8, 128>}]} {
    %c0 = arith.constant 0 : index
    %c0_0 = arith.constant 0 : index
    %0 = vector.load %arg1[%c0, %c0_0] : memref<8x32xf32, #tpu.memory_space<vmem>>, vector<8x32xf32>
    %c0_1 = arith.constant 0 : index
    %c0_2 = arith.constant 0 : index
    %1 = vector.load %arg2[%c0_1, %c0_2] : memref<32x128xf32, #tpu.memory_space<vmem>>, vector<32x128xf32>
    %cst = arith.constant dense<0.000000e+00> : vector<8x128xf32>
    %2 = tpu.matmul %0, %1, %cst {dimension_numbers = #tpu.dot_dimension_numbers<[1], [0], [0], [1], [0, 0, 1, 1], [], []>} : vector<8x32xf32>, vector<32x128xf32>, vector<8x128xf32> -> vector<8x128xf32>
    %c0_3 = arith.constant 0 : index
    %c0_4 = arith.constant 0 : index
    %3 = vector.load %arg3[%c0_3, %c0_4] : memref<1x128xf32, #tpu.memory_space<vmem>>, vector<1x128xf32>
    %4 = vector.broadcast %3 : vector<1x128xf32> to vector<8x128xf32>
    %5 = arith.addf %2, %4 : vector<8x128xf32>
    %cst_5 = arith.constant dense<0xFF800000> : vector<8xf32>
    %6 = vector.multi_reduction <maximumf>, %5, %cst_5 [1] : vector<8x128xf32> to vector<8xf32>
    %7 = vector.shape_cast %6 : vector<8xf32> to vector<8x1xf32>
    %8 = vector.broadcast %7 : vector<8x1xf32> to vector<8x128xf32>
    %9 = arith.subf %5, %8 : vector<8x128xf32>
    %10 = math.exp %9 : vector<8x128xf32>
    %cst_6 = arith.constant dense<0.000000e+00> : vector<8xf32>
    %11 = vector.multi_reduction <add>, %10, %cst_6 [1] : vector<8x128xf32> to vector<8xf32>
    %12 = vector.shape_cast %11 : vector<8xf32> to vector<8x1xf32>
    %13 = math.log %12 : vector<8x1xf32>
    %14 = vector.broadcast %13 : vector<8x1xf32> to vector<8x128xf32>
    %15 = arith.subf %9, %14 : vector<8x128xf32>
    %c0_7 = arith.constant 0 : index
    %c0_8 = arith.constant 0 : index
    %16 = vector.load %arg4[%c0_7, %c0_8] : memref<8x128xf32, #tpu.memory_space<vmem>>, vector<8x128xf32>
    tpu.vector_store %arg4[%c0_7, %c0_8], %15 {strides = array<i32>} : memref<8x128xf32, #tpu.memory_space<vmem>>, vector<8x128xf32>,
    return
  }
  func.func @transform_0(%arg0: i32) -> (i32, i32) {
    %c0_i32 = arith.constant 0 : i32
    %c0_i32_0 = arith.constant 0 : i32
    return %arg0, %c0_i32 : i32, i32
  }
  func.func @transform_1(%arg0: i32) -> (i32, i32) {
    %c0_i32 = arith.constant 0 : i32
    %c0_i32_0 = arith.constant 0 : i32
    %c0_i32_1 = arith.constant 0 : i32
    return %c0_i32, %c0_i32_0 : i32, i32
  }
  func.func @transform_2(%arg0: i32) -> (i32, i32) {
    %c0_i32 = arith.constant 0 : i32
    %c0_i32_0 = arith.constant 0 : i32
    %c0_i32_1 = arith.constant 0 : i32
    return %c0_i32, %c0_i32_0 : i32, i32
  }
  func.func @transform_3(%arg0: i32) -> (i32, i32) {
    %c0_i32 = arith.constant 0 : i32
    %c0_i32_0 = arith.constant 0 : i32
    return %arg0, %c0_i32 : i32, i32
  }
}

module attributes {stable_mosaic.version = 11 : i64} {
  func.func @_classifier_kernel(%arg0: i32, %arg1: memref<8x32xf32, #tpu.memory_space<vmem>>, %arg2: memref<32x128xf32, #tpu.memory_space<vmem>>, %arg3: memref<1x128xf32, #tpu.memory_space<vmem>>, %arg4: memref<8x128xf32, #tpu.memory_space<vmem>>) attributes {dimension_semantics = [#tpu.dimension_semantics<parallel>], iteration_bounds = array<i64: 1>, scalar_prefetch = 0 : i64, scratch_operands = 0 : i64, tpu.core_type = #tpu.core_type<tc>, window_params = [{transform_indices = @transform_0, window_bounds = array<i64: 8, 32>}, {pipeline_mode = #tpu.pipeline_mode<synchronous>, transform_indices = @transform_1, window_bounds = array<i64: 32, 128>}, {pipeline_mode = #tpu.pipeline_mode<synchronous>, transform_indices = @transform_2, window_bounds = array<i64: 1, 128>}, {transform_indices = @transform_3, window_bounds = array<i64: 8, 128>}]} {
    %c0 = arith.constant 0 : index
    %c0_0 = arith.constant 0 : index
    %0 = vector.load %arg1[%c0, %c0_0] : memref<8x32xf32, #tpu.memory_space<vmem>>, vector<8x32xf32>
    %c0_1 = arith.constant 0 : index
    %c0_2 = arith.constant 0 : index
    %1 = vector.load %arg2[%c0_1, %c0_2] : memref<32x128xf32, #tpu.memory_space<vmem>>, vector<32x128xf32>
    %cst = arith.constant dense<0.000000e+00> : vector<8x128xf32>
    %2 = tpu.matmul %0, %1, %cst {dimension_numbers = #tpu.dot_dimension_numbers<[1], [0], [0], [1], [0, 0, 1, 1], [], []>} : vector<8x32xf32>, vector<32x128xf32>, vector<8x128xf32> -> vector<8x128xf32>
    %c0_3 = arith.constant 0 : index
    %c0_4 = arith.constant 0 : index
    %3 = vector.load %arg3[%c0_3, %c0_4] : memref<1x128xf32, #tpu.memory_space<vmem>>, vector<1x128xf32>
    %4 = vector.broadcast %3 : vector<1x128xf32> to vector<8x128xf32>
    %5 = arith.addf %2, %4 : vector<8x128xf32>
    %cst_5 = arith.constant dense<0xFF800000> : vector<8xf32>
    %6 = vector.multi_reduction <maximumf>, %5, %cst_5 [1] : vector<8x128xf32> to vector<8xf32>
    %7 = vector.shape_cast %6 : vector<8xf32> to vector<8x1xf32>
    %8 = vector.broadcast %7 : vector<8x1xf32> to vector<8x128xf32>
    %9 = arith.subf %5, %8 : vector<8x128xf32>
    %10 = math.exp %9 : vector<8x128xf32>
    %cst_6 = arith.constant dense<0.000000e+00> : vector<8xf32>
    %11 = vector.multi_reduction <add>, %10, %cst_6 [1] : vector<8x128xf32> to vector<8xf32>
    %12 = vector.shape_cast %11 : vector<8xf32> to vector<8x1xf32>
    %13 = math.log %12 : vector<8x1xf32>
    %14 = vector.broadcast %13 : vector<8x1xf32> to vector<8x128xf32>
    %15 = arith.subf %9, %14 : vector<8x128xf32>
    %c0_7 = arith.constant 0 : index
    %c0_8 = arith.constant 0 : index
    %16 = vector.load %arg4[%c0_7, %c0_8] : memref<8x128xf32, #tpu.memory_space<vmem>>, vector<8x128xf32>
    tpu.vector_store %arg4[%c0_7, %c0_8], %15 {strides = array<i32>} : memref<8x128xf32, #tpu.memory_space<vmem>>, vector<8x128xf32>,
    return
  }
  func.func @transform_0(%arg0: i32) -> (i32, i32) {
    %c0_i32 = arith.constant 0 : i32
    %c0_i32_0 = arith.constant 0 : i32
    return %arg0, %c0_i32 : i32, i32
  }
  func.func @transform_1(%arg0: i32) -> (i32, i32) {
    %c0_i32 = arith.constant 0 : i32
    %c0_i32_0 = arith.constant 0 : i32
    %c0_i32_1 = arith.constant 0 : i32
    return %c0_i32, %c0_i32_0 : i32, i32
  }
  func.func @transform_2(%arg0: i32) -> (i32, i32) {
    %c0_i32 = arith.constant 0 : i32
    %c0_i32_0 = arith.constant 0 : i32
    %c0_i32_1 = arith.constant 0 : i32
    return %c0_i32, %c0_i32_0 : i32, i32
  }
  func.func @transform_3(%arg0: i32) -> (i32, i32) {
    %c0_i32 = arith.constant 0 : i32
    %c0_i32_0 = arith.constant 0 : i32
    return %arg0, %c0_i32 : i32, i32
  }
}

</mosaic_0001>

<bundles_post_ra>
// kernel: tpu_custom_call.1
= control target key start
LH: loop header
LB: loop body
LE: loop exit
PB: predicated region body
PF: predicated region fallthrough
CT: control target
= control target key end

     0   :  { %8 = vsyncpa [#allocation3], 0  ;;  %s336_s0 = inlined_call_operand.hbm [shape: f32[8,32], index: 0, kind: input, shape index: {}]   ;;  %s337_s1 = inlined_call_operand.hbm [shape: f32[32,128], index: 1, kind: input, shape index: {}]   ;;  %s338_s2 = inlined_call_operand.vmem [shape: f32[1,128], index: 2, kind: input, shape index: {}]   ;;  %s339_s3 = inlined_call_operand.hbm [shape: f32[8,128], index: 3, kind: output, shape index: {}]  }
   0x1   :  { %9 = vsyncpa [#allocation6], 0 }
   0x2   :  { %10 = vsyncpa [#allocation4], 0  ;;  %s262_s12 = smov [#allocation2]   ;;  %s263_s14 = smov [#allocation5]  }
   0x3   :  { %s17_s13 = sshll.u32 %s262_s12, 4  ;;  %s26_s15 = sshll.u32 %s263_s14, 4  ;;  %s18_s13 = int_to_ptr.vmem [resolvable:$true] %s17_s13  ;;  %s290_s15 = int_to_ptr.vmem [resolvable:$true] %s26_s15 }
   0x4   :  { %s190_s18 = scalar_lea.hbm %s336_s0, 128 }
   0x5   :  { %p191_p0 = scmp.ne.s32.totalorder %s336_s0, %s190_s18  ;;  %p194_p1 = scmp.lt.u32.totalorder %s190_s18, %s336_s0 }
   0x7   :  { %p196_p2 = pnand %p194_p1, %p191_p0 }
   0x9   :  { %199 = shalt.err (!%p196_p2)
}
   0xa   :  { %s200_s23 = scalar_lea.vmem %s18_s13, 128  ;;  %p205_p4 = scmp.lt.s32.totalorder %s18_s13, %s18_s13 }
   0xb   :  { %p201_p3 = scmp.ne.s32.totalorder %s18_s13, %s200_s23  ;;  %p206_p5 = scmp.lt.s32.totalorder %s200_s23, %s200_s23 }
   0xd   :  { %p207_p6 = por %p206_p5, %p205_p4 }
   0xf   :  { %p208_p7 = pnand %p207_p6, %p201_p3 }
  0x11   :  { %211 = shalt.err (!%p208_p7)
}
  0x12   :  { %20 = dma.hbm_to_vmem [thread:$0]  %s336_s0, 128, %s18_s13, [#allocation3]  }
  0x13   :  { %s212_s28 = scalar_lea.hbm %s337_s1, 512 }
  0x14   :  { %p213_p8 = scmp.ne.s32.totalorder %s337_s1, %s212_s28  ;;  %p216_p9 = scmp.lt.u32.totalorder %s212_s28, %s337_s1 }
  0x16   :  { %p218_p10 = pnand %p216_p9, %p213_p8 }
  0x18   :  { %221 = shalt.err (!%p218_p10)
}
  0x19   :  { %s222_s6 = scalar_lea.vmem %s290_s15, 512  ;;  %p227_p12 = scmp.lt.s32.totalorder %s290_s15, %s290_s15 }
  0x1a   :  { %p223_p11 = scmp.ne.s32.totalorder %s290_s15, %s222_s6  ;;  %p228_p13 = scmp.lt.s32.totalorder %s222_s6, %s222_s6 }
  0x1c   :  { %p229_p0 = por %p228_p13, %p227_p12 }
  0x1e   :  { %p230_p1 = pnand %p229_p0, %p223_p11 }
  0x20   :  { %233 = shalt.err (!%p230_p1)
}
  0x21   :  { %s264_s0 = smov 128   ;;  %s265_s7 = smov 8  }
  0x22   :  { %32 = dma.hbm_to_vmem [thread:$0]  %s337_s1, 512, %s290_s15, [#allocation6], %s264_s0, %s264_s0, %s265_s7  }
  0x23   :  { %256 = dma.done.wait [#allocation3], 128  }
  0x24   :  { %257 = vsyncadd [#allocation3], 4294967168 }
  0x25   :  { %258 = dma.done.wait [#allocation6], 512  }
  0x26   :  { %259 = vsyncadd [#allocation6], 4294966784  ;;  %v266_v0 = vmov 0.0|0.0   ;;  %vm267_vm0 = vmmov 0   ;;  %v268_v1 = vmov 0.0   ;;  %v42_v2 = vld [vmem:[#allocation5] sm:$0xff] }
  0x27   :  { %172 = vmatprep.subr.bf16.mxu0 %v266_v0  ;;  %169 = vmatprep.mubr.msk.f32.mxu0 %vm267_vm0, %v268_v1  ;;  %v43_v3 = vld [vmem:[#allocation5 + $0x8] sm:$0xff]  ;;  %v44_v4 = vld [vmem:[#allocation5 + $0x10] sm:$0xff]  ;;  %v45_v6 = vld [vmem:[#allocation5 + $0x18] sm:$0xff]  ;;  %vm53_vm1 = vcmask 261120   ;;  %s269_s11 = smov [#allocation7]  }
  0x28   :  { %v173_v5 = vpack.c.bf16 %v43_v3, %v42_v2  ;;  %v176_v7 = vpack.c.bf16 %v45_v6, %v44_v4  ;;  %v41_v8 = vld [vmem:[#allocation2] sm:$0xff]  ;;  %s144_s12 = sshll.u32 %s269_s11, 4  ;;  %s145_s12 = int_to_ptr.vmem [resolvable:$true] %s144_s12 }
  0x29   :  { %v154_v9 = vld [vmem:[%s338_s2] ss:$0 sm:$0xff]  ;;  %s234_s2 = scalar_lea.vmem %s145_s12, 128  ;;  %p239_p3 = scmp.lt.s32.totalorder %s145_s12, %s145_s12 }
  0x2a   :  { %174 = vmatpush3.bf16.msra.mxu0 %v173_v5  ;;  %p235_p2 = scmp.ne.s32.totalorder %s145_s12, %s234_s2  ;;  %p240_p4 = scmp.lt.s32.totalorder %s234_s2, %s234_s2 }
  0x2b   :  { %175 = vmatprep.subr.bf16.mxu0 %v266_v0 }
  0x2c   :  { %p241_p5 = por %p240_p4, %p239_p3 }
  0x2e   :  { %177 = vmatpush3.bf16.msra.mxu0 %v176_v7  ;;  %p242_p6 = pnand %p241_p5, %p235_p2 }
  0x31   :  { %170 = vmatmul.mubr.msk.f32.vlgmr.msra.gmra.mrb[0].mxu0 %vm53_vm1, %v41_v8 }
 0x104   :  { %v123_v10 = vpop.f32.mrb[0].mxu0 }
 0x105   :  { %v124_v11 = vadd.f32 %v154_v9, %v123_v10  ;;  %v171_v12 = vpop.f32.mrb[1].mxu0 }
 0x107   :  { %127 = vmax.xlane.f32.xlu0 %v124_v11 }
 0x194   :  { %v128_v13 = vpop.xlane.xlu0 %127 }
 0x195   :  { %v129_v14 = vsub.f32 %v124_v11, %v128_v13 }
 0x197   :  { %v130_v15 = vmul.f32 1.442695, %v129_v14 }
 0x199   :  { %186 = vpow2.f32 %v130_v15 }
 0x1a3   :  { %v187_v16 = vpop.eup %186 }
 0x1a4   :  { %132 = vadd.xlane.f32.xlu0 %v187_v16 }
 0x231   :  { %v133_v17 = vpop.xlane.xlu0 %132 }
 0x232   :  { %188 = vlog2.f32 %v133_v17 }
 0x23c   :  { %v189_v18 = vpop.eup %188 }
 0x23d   :  { %v135_v19 = vmul.f32 0.6931472, %v189_v18 }
 0x23f   :  { %v136_v20 = vsub.f32 %v129_v14, %v135_v19 }
 0x241   :  { %137 = vst [vmem:[#allocation7] sm:$0xff] %v136_v20 }
 0x242   :  { %245 = shalt.err (!%p242_p6)
}
 0x243   :  { %s246_s15 = scalar_lea.hbm %s339_s3, 128 }
 0x244   :  { %p247_p7 = scmp.ne.s32.totalorder %s339_s3, %s246_s15  ;;  %p250_p8 = scmp.lt.u32.totalorder %s246_s15, %s339_s3 }
 0x246   :  { %p252_p9 = pnand %p250_p8, %p247_p7 }
 0x248   :  { %255 = shalt.err (!%p252_p9)
}
 0x249   :  { %147 = dma.vmem_to_hbm [thread:$0]  %s145_s12, 128, %s339_s3, [#allocation4]  }
 0x24a   :  { %260 = dma.done.wait [#allocation4], 128  }
 0x24b   :  { %261 = vsyncadd [#allocation4], 4294967168 }
 0x24c   :  { %151 = vsyncpa [#allocation3], 1 }
 0x24d   :  { %152 = vsyncpa [#allocation6], 1 }
 0x24e   :  { %153 = vsyncpa [#allocation4], 1 }

// kernel: tpu_custom_call.1
= control target key start
LH: loop header
LB: loop body
LE: loop exit
PB: predicated region body
PF: predicated region fallthrough
CT: control target
= control target key end

     0   :  { %8 = vsyncpa [#allocation3], 0  ;;  %s336_s0 = inlined_call_operand.hbm [shape: f32[8,32], index: 0, kind: input, shape index: {}]   ;;  %s337_s1 = inlined_call_operand.hbm [shape: f32[32,128], index: 1, kind: input, shape index: {}]   ;;  %s338_s2 = inlined_call_operand.vmem [shape: f32[1,128], index: 2, kind: input, shape index: {}]   ;;  %s339_s3 = inlined_call_operand.hbm [shape: f32[8,128], index: 3, kind: output, shape index: {}]  }
   0x1   :  { %9 = vsyncpa [#allocation6], 0 }
   0x2   :  { %10 = vsyncpa [#allocation4], 0  ;;  %s262_s12 = smov [#allocation2]   ;;  %s263_s14 = smov [#allocation5]  }
   0x3   :  { %s17_s13 = sshll.u32 %s262_s12, 4  ;;  %s26_s15 = sshll.u32 %s263_s14, 4  ;;  %s18_s13 = int_to_ptr.vmem [resolvable:$true] %s17_s13  ;;  %s290_s15 = int_to_ptr.vmem [resolvable:$true] %s26_s15 }
   0x4   :  { %s190_s18 = scalar_lea.hbm %s336_s0, 128 }
   0x5   :  { %p191_p0 = scmp.ne.s32.totalorder %s336_s0, %s190_s18  ;;  %p194_p1 = scmp.lt.u32.totalorder %s190_s18, %s336_s0 }
   0x7   :  { %p196_p2 = pnand %p194_p1, %p191_p0 }
   0x9   :  { %199 = shalt.err (!%p196_p2)
}
   0xa   :  { %s200_s23 = scalar_lea.vmem %s18_s13, 128  ;;  %p205_p4 = scmp.lt.s32.totalorder %s18_s13, %s18_s13 }
   0xb   :  { %p201_p3 = scmp.ne.s32.totalorder %s18_s13, %s200_s23  ;;  %p206_p5 = scmp.lt.s32.totalorder %s200_s23, %s200_s23 }
   0xd   :  { %p207_p6 = por %p206_p5, %p205_p4 }
   0xf   :  { %p208_p7 = pnand %p207_p6, %p201_p3 }
  0x11   :  { %211 = shalt.err (!%p208_p7)
}
  0x12   :  { %20 = dma.hbm_to_vmem [thread:$0]  %s336_s0, 128, %s18_s13, [#allocation3]  }
  0x13   :  { %s212_s28 = scalar_lea.hbm %s337_s1, 512 }
  0x14   :  { %p213_p8 = scmp.ne.s32.totalorder %s337_s1, %s212_s28  ;;  %p216_p9 = scmp.lt.u32.totalorder %s212_s28, %s337_s1 }
  0x16   :  { %p218_p10 = pnand %p216_p9, %p213_p8 }
  0x18   :  { %221 = shalt.err (!%p218_p10)
}
  0x19   :  { %s222_s6 = scalar_lea.vmem %s290_s15, 512  ;;  %p227_p12 = scmp.lt.s32.totalorder %s290_s15, %s290_s15 }
  0x1a   :  { %p223_p11 = scmp.ne.s32.totalorder %s290_s15, %s222_s6  ;;  %p228_p13 = scmp.lt.s32.totalorder %s222_s6, %s222_s6 }
  0x1c   :  { %p229_p0 = por %p228_p13, %p227_p12 }
  0x1e   :  { %p230_p1 = pnand %p229_p0, %p223_p11 }
  0x20   :  { %233 = shalt.err (!%p230_p1)
}
  0x21   :  { %s264_s0 = smov 128   ;;  %s265_s7 = smov 8  }
  0x22   :  { %32 = dma.hbm_to_vmem [thread:$0]  %s337_s1, 512, %s290_s15, [#allocation6], %s264_s0, %s264_s0, %s265_s7  }
  0x23   :  { %256 = dma.done.wait [#allocation3], 128  }
  0x24   :  { %257 = vsyncadd [#allocation3], 4294967168 }
  0x25   :  { %258 = dma.done.wait [#allocation6], 512  }
  0x26   :  { %259 = vsyncadd [#allocation6], 4294966784  ;;  %v266_v0 = vmov 0.0|0.0   ;;  %vm267_vm0 = vmmov 0   ;;  %v268_v1 = vmov 0.0   ;;  %v42_v2 = vld [vmem:[#allocation5] sm:$0xff] }
  0x27   :  { %172 = vmatprep.subr.bf16.mxu0 %v266_v0  ;;  %169 = vmatprep.mubr.msk.f32.mxu0 %vm267_vm0, %v268_v1  ;;  %v43_v3 = vld [vmem:[#allocation5 + $0x8] sm:$0xff]  ;;  %v44_v4 = vld [vmem:[#allocation5 + $0x10] sm:$0xff]  ;;  %v45_v6 = vld [vmem:[#allocation5 + $0x18] sm:$0xff]  ;;  %vm53_vm1 = vcmask 261120   ;;  %s269_s11 = smov [#allocation7]  }
  0x28   :  { %v173_v5 = vpack.c.bf16 %v43_v3, %v42_v2  ;;  %v176_v7 = vpack.c.bf16 %v45_v6, %v44_v4  ;;  %v41_v8 = vld [vmem:[#allocation2] sm:$0xff]  ;;  %s144_s12 = sshll.u32 %s269_s11, 4  ;;  %s145_s12 = int_to_ptr.vmem [resolvable:$true] %s144_s12 }
  0x29   :  { %v154_v9 = vld [vmem:[%s338_s2] ss:$0 sm:$0xff]  ;;  %s234_s2 = scalar_lea.vmem %s145_s12, 128  ;;  %p239_p3 = scmp.lt.s32.totalorder %s145_s12, %s145_s12 }
  0x2a   :  { %174 = vmatpush3.bf16.msra.mxu0 %v173_v5  ;;  %p235_p2 = scmp.ne.s32.totalorder %s145_s12, %s234_s2  ;;  %p240_p4 = scmp.lt.s32.totalorder %s234_s2, %s234_s2 }
  0x2b   :  { %175 = vmatprep.subr.bf16.mxu0 %v266_v0 }
  0x2c   :  { %p241_p5 = por %p240_p4, %p239_p3 }
  0x2e   :  { %177 = vmatpush3.bf16.msra.mxu0 %v176_v7  ;;  %p242_p6 = pnand %p241_p5, %p235_p2 }
  0x31   :  { %170 = vmatmul.mubr.msk.f32.vlgmr.msra.gmra.mrb[0].mxu0 %vm53_vm1, %v41_v8 }
 0x104   :  { %v123_v10 = vpop.f32.mrb[0].mxu0 }
 0x105   :  { %v124_v11 = vadd.f32 %v154_v9, %v123_v10  ;;  %v171_v12 = vpop.f32.mrb[1].mxu0 }
 0x107   :  { %127 = vmax.xlane.f32.xlu0 %v124_v11 }
 0x194   :  { %v128_v13 = vpop.xlane.xlu0 %127 }
 0x195   :  { %v129_v14 = vsub.f32 %v124_v11, %v128_v13 }
 0x197   :  { %v130_v15 = vmul.f32 1.442695, %v129_v14 }
 0x199   :  { %186 = vpow2.f32 %v130_v15 }
 0x1a3   :  { %v187_v16 = vpop.eup %186 }
 0x1a4   :  { %132 = vadd.xlane.f32.xlu0 %v187_v16 }
 0x231   :  { %v133_v17 = vpop.xlane.xlu0 %132 }
 0x232   :  { %188 = vlog2.f32 %v133_v17 }
 0x23c   :  { %v189_v18 = vpop.eup %188 }
 0x23d   :  { %v135_v19 = vmul.f32 0.6931472, %v189_v18 }
 0x23f   :  { %v136_v20 = vsub.f32 %v129_v14, %v135_v19 }
 0x241   :  { %137 = vst [vmem:[#allocation7] sm:$0xff] %v136_v20 }
 0x242   :  { %245 = shalt.err (!%p242_p6)
}
 0x243   :  { %s246_s15 = scalar_lea.hbm %s339_s3, 128 }
 0x244   :  { %p247_p7 = scmp.ne.s32.totalorder %s339_s3, %s246_s15  ;;  %p250_p8 = scmp.lt.u32.totalorder %s246_s15, %s339_s3 }
 0x246   :  { %p252_p9 = pnand %p250_p8, %p247_p7 }
 0x248   :  { %255 = shalt.err (!%p252_p9)
}
 0x249   :  { %147 = dma.vmem_to_hbm [thread:$0]  %s145_s12, 128, %s339_s3, [#allocation4]  }
 0x24a   :  { %260 = dma.done.wait [#allocation4], 128  }
 0x24b   :  { %261 = vsyncadd [#allocation4], 4294967168 }
 0x24c   :  { %151 = vsyncpa [#allocation3], 1 }
 0x24d   :  { %152 = vsyncpa [#allocation6], 1 }
 0x24e   :  { %153 = vsyncpa [#allocation4], 1 }

</bundles_post_ra>
